<compile_context>
chip_gen: v6e
topology: v6e:2x2x1
jax: 0.10.0
libtpu: 0.0.40
codegen_flags: <defaults>
</compile_context>

<pallas_src>
import jax
import jax.numpy as jnp
from jax.experimental import pallas as pl
from jax.experimental.pallas import tpu as pltpu

NEG_SLOPE = 0.01
BN_EPS = 1e-5


def residual_block_kernel(x_ref, w_ref, b_ref, g_ref, beta_ref, out_ref):
    x = x_ref[...].astype(jnp.float32)                      # (B, F) f32

    # Linear: bf16 operands on the MXU, f32 accumulation.
    y = jnp.dot(
        x.astype(jnp.bfloat16), w_ref[...],
        preferred_element_type=jnp.float32,
    ) + b_ref[...]

    # BatchNorm1d, training-mode semantics: biased statistics over the batch.
    mean = jnp.mean(y, axis=0, keepdims=True)
    var = jnp.mean((y - mean) ** 2, axis=0, keepdims=True)
    y_hat = (y - mean) * jax.lax.rsqrt(var + BN_EPS)
    y = g_ref[...] * y_hat + beta_ref[...]

    # LeakyReLU(0.01) as a single max (valid for slope < 1), then residual add.
    y = jnp.maximum(y, NEG_SLOPE * y)
    out_ref[...] = (y + x).astype(out_ref.dtype)


def residual_block_forward(x, w_bf16, b, gamma, beta):
    """x: (B, F) f32; w_bf16: (F, F) bf16 stored as (in, out); b/gamma/beta: (1, F) f32."""
    B, F = x.shape
    vmem = pl.BlockSpec(memory_space=pltpu.MemorySpace.VMEM)  # whole array in VMEM
    return pl.pallas_call(
        residual_block_kernel,
        out_shape=jax.ShapeDtypeStruct((B, F), jnp.float32),
        in_specs=[vmem] * 5,
        out_specs=vmem,
        compiler_params=pltpu.CompilerParams(vmem_limit_bytes=32 << 20),
    )(x, w_bf16, b, gamma, beta)


def init_params(key, features):
    """PyTorch-style init: Linear W,b ~ U(-1/sqrt(fan_in), 1/sqrt(fan_in));
    BN gamma=1, beta=0. Weight stored transposed (in, out) and cast to bf16."""
    kw, kb = jax.random.split(key)
    bound = 1.0 / (features ** 0.5)
    w = jax.random.uniform(kw, (features, features), jnp.float32, -bound, bound)
    b = jax.random.uniform(kb, (1, features), jnp.float32, -bound, bound)
    gamma = jnp.ones((1, features), jnp.float32)
    beta = jnp.zeros((1, features), jnp.float32)
    return w.astype(jnp.bfloat16), b, gamma, beta


def _reference(x, w_bf16, b, gamma, beta):
    """Pure-JAX reference with identical numerics (bf16 operands, f32 accum)."""
    y = jnp.dot(x.astype(jnp.bfloat16), w_bf16,
                preferred_element_type=jnp.float32) + b
    mean = jnp.mean(y, axis=0, keepdims=True)
    var = jnp.mean((y - mean) ** 2, axis=0, keepdims=True)
    y = gamma * (y - mean) * jax.lax.rsqrt(var + BN_EPS) + beta
    y = jnp.where(y > 0, y, NEG_SLOPE * y)
    return y + x


if __name__ == "__main__":
    key = jax.random.PRNGKey(0)
    k_x, k_p = jax.random.split(key)

    batch, features = 128, 256          # sublane/lane aligned (8, 128)
    x = jax.random.normal(k_x, (batch, features), dtype=jnp.float32)
    w_bf16, b, gamma, beta = init_params(k_p, features)

    out = residual_block_forward(x, w_bf16, b, gamma, beta)
    out = jax.block_until_ready(out)

    assert out.shape == (batch, features), out.shape
    ref = _reference(x, w_bf16, b, gamma, beta)
    assert jnp.allclose(out, ref, atol=1e-2, rtol=1e-2), "mismatch vs reference"
    print("KERNEL_OK")
</pallas_src>

<mosaic_0001>
module attributes {stable_mosaic.version = 11 : i64} {
  func.func @residual_block_kernel(%arg0: memref<128x256xf32, #tpu.memory_space<vmem>>, %arg1: memref<256x256xbf16, #tpu.memory_space<vmem>>, %arg2: memref<1x256xf32, #tpu.memory_space<vmem>>, %arg3: memref<1x256xf32, #tpu.memory_space<vmem>>, %arg4: memref<1x256xf32, #tpu.memory_space<vmem>>, %arg5: memref<128x256xf32, #tpu.memory_space<vmem>>) attributes {dimension_semantics = [], scalar_prefetch = 0 : i64, scratch_operands = 0 : i64, tpu.core_type = #tpu.core_type<tc>} {
    %c0 = arith.constant 0 : index
    %c0_0 = arith.constant 0 : index
    %0 = vector.load %arg0[%c0, %c0_0] : memref<128x256xf32, #tpu.memory_space<vmem>>, vector<128x256xf32>
    %1 = arith.truncf %0 : vector<128x256xf32> to vector<128x256xbf16>
    %c0_1 = arith.constant 0 : index
    %c0_2 = arith.constant 0 : index
    %2 = vector.load %arg1[%c0_1, %c0_2] : memref<256x256xbf16, #tpu.memory_space<vmem>>, vector<256x256xbf16>
    %cst = arith.constant dense<0.000000e+00> : vector<128x256xf32>
    %3 = tpu.matmul %1, %2, %cst {dimension_numbers = #tpu.dot_dimension_numbers<[1], [0], [0], [1], [0, 0, 1, 1], [], []>} : vector<128x256xbf16>, vector<256x256xbf16>, vector<128x256xf32> -> vector<128x256xf32>
    %c0_3 = arith.constant 0 : index
    %c0_4 = arith.constant 0 : index
    %4 = vector.load %arg2[%c0_3, %c0_4] : memref<1x256xf32, #tpu.memory_space<vmem>>, vector<1x256xf32>
    %5 = vector.broadcast %4 : vector<1x256xf32> to vector<128x256xf32>
    %6 = arith.addf %3, %5 : vector<128x256xf32>
    %cst_5 = arith.constant dense<0.000000e+00> : vector<256xf32>
    %7 = vector.multi_reduction <add>, %6, %cst_5 [0] : vector<128x256xf32> to vector<256xf32>
    %8 = vector.shape_cast %7 : vector<256xf32> to vector<1x256xf32>
    %cst_6 = arith.constant 1.280000e+02 : f32
    %9 = vector.broadcast %cst_6 : f32 to vector<1x256xf32>
    %10 = arith.divf %8, %9 : vector<1x256xf32>
    %11 = vector.broadcast %10 : vector<1x256xf32> to vector<128x256xf32>
    %12 = arith.subf %6, %11 : vector<128x256xf32>
    %13 = arith.mulf %12, %12 : vector<128x256xf32>
    %cst_7 = arith.constant dense<0.000000e+00> : vector<256xf32>
    %14 = vector.multi_reduction <add>, %13, %cst_7 [0] : vector<128x256xf32> to vector<256xf32>
    %15 = vector.shape_cast %14 : vector<256xf32> to vector<1x256xf32>
    %cst_8 = arith.constant 1.280000e+02 : f32
    %16 = vector.broadcast %cst_8 : f32 to vector<1x256xf32>
    %17 = arith.divf %15, %16 : vector<1x256xf32>
    %18 = vector.broadcast %10 : vector<1x256xf32> to vector<128x256xf32>
    %19 = arith.subf %6, %18 : vector<128x256xf32>
    %cst_9 = arith.constant 9.99999974E-6 : f32
    %20 = vector.broadcast %cst_9 : f32 to vector<1x256xf32>
    %21 = arith.addf %17, %20 : vector<1x256xf32>
    %22 = math.rsqrt %21 : vector<1x256xf32>
    %23 = vector.broadcast %22 : vector<1x256xf32> to vector<128x256xf32>
    %24 = arith.mulf %19, %23 : vector<128x256xf32>
    %c0_10 = arith.constant 0 : index
    %c0_11 = arith.constant 0 : index
    %25 = vector.load %arg3[%c0_10, %c0_11] : memref<1x256xf32, #tpu.memory_space<vmem>>, vector<1x256xf32>
    %26 = vector.broadcast %25 : vector<1x256xf32> to vector<128x256xf32>
    %27 = arith.mulf %26, %24 : vector<128x256xf32>
    %c0_12 = arith.constant 0 : index
    %c0_13 = arith.constant 0 : index
    %28 = vector.load %arg4[%c0_12, %c0_13] : memref<1x256xf32, #tpu.memory_space<vmem>>, vector<1x256xf32>
    %29 = vector.broadcast %28 : vector<1x256xf32> to vector<128x256xf32>
    %30 = arith.addf %27, %29 : vector<128x256xf32>
    %cst_14 = arith.constant 0.00999999977 : f32
    %31 = vector.broadcast %cst_14 : f32 to vector<128x256xf32>
    %32 = arith.mulf %31, %30 : vector<128x256xf32>
    %33 = arith.maximumf %30, %32 : vector<128x256xf32>
    %34 = arith.addf %33, %0 : vector<128x256xf32>
    %c0_15 = arith.constant 0 : index
    %c0_16 = arith.constant 0 : index
    %35 = vector.load %arg5[%c0_15, %c0_16] : memref<128x256xf32, #tpu.memory_space<vmem>>, vector<128x256xf32>
    tpu.vector_store %arg5[%c0_15, %c0_16], %34 {strides = array<i32>} : memref<128x256xf32, #tpu.memory_space<vmem>>, vector<128x256xf32>,
    return
  }
}

</mosaic_0001>

<bundles_post_ra>
// kernel: tpu_custom_call.1
= control target key start
LH: loop header
LB: loop body
LE: loop exit
PB: predicated region body
PF: predicated region fallthrough
CT: control target
= control target key end

     0   :  { %10 = vsyncpa [#allocation3], 0  ;;  %s1616_s0 = inlined_call_operand.hbm [shape: f32[128,256], index: 0, kind: input, shape index: {}]   ;;  %s1617_s1 = inlined_call_operand.hbm [shape: bf16[256,256], index: 1, kind: input, shape index: {}]   ;;  %s1618_s2 = inlined_call_operand.vmem [shape: f32[1,256], index: 2, kind: input, shape index: {}]   ;;  %s1619_s3 = inlined_call_operand.vmem [shape: f32[1,256], index: 3, kind: input, shape index: {}]   ;;  %s1620_s4 = inlined_call_operand.vmem [shape: f32[1,256], index: 4, kind: input, shape index: {}]   ;;  %s1621_s5 = inlined_call_operand.hbm [shape: f32[128,256], index: 5, kind: output, shape index: {}]  }
   0x1   :  { %11 = vsyncpa [#allocation6], 0 }
   0x2   :  { %12 = vsyncpa [#allocation4], 0  ;;  %s1030_s18 = smov [#allocation2]  }
   0x3   :  { %s18_s19 = sshll.u32 %s1030_s18, 4  ;;  %s19_s19 = int_to_ptr.vmem [resolvable:$true] %s18_s19 }
   0x4   :  { %s972_s20 = scalar_lea.vmem %s19_s19, 4096  ;;  %p977_p1 = scmp.lt.s32.totalorder %s19_s19, %s19_s19 }
   0x5   :  { %p973_p0 = scmp.ne.s32.totalorder %s19_s19, %s972_s20  ;;  %p978_p2 = scmp.lt.s32.totalorder %s972_s20, %s972_s20 }
   0x7   :  { %p979_p3 = por %p978_p2, %p977_p1 }
   0x9   :  { %p980_p4 = pnand %p979_p3, %p973_p0 }
   0xb   :  { %983 = shalt.err (!%p980_p4)
}
   0xc   :  { %s1031_s21 = smov 256   ;;  %s1032_s22 = smov 16  }
   0xd   :  { %24 = dma.hbm_to_vmem [thread:$0]  %s1616_s0, 4096, %s19_s19, [#allocation3], %s1031_s21, %s1031_s21, %s1032_s22  }
   0xe   :  { %s1033_s25 = smov [#allocation5]  }
   0xf   :  { %s30_s26 = sshll.u32 %s1033_s25, 4  ;;  %s31_s26 = int_to_ptr.vmem [resolvable:$true] %s30_s26 }
  0x10   :  { %s992_s27 = scalar_lea.vmem %s31_s26, 4096  ;;  %p997_p6 = scmp.lt.s32.totalorder %s31_s26, %s31_s26 }
  0x11   :  { %p993_p5 = scmp.ne.s32.totalorder %s31_s26, %s992_s27  ;;  %p998_p7 = scmp.lt.s32.totalorder %s992_s27, %s992_s27 }
  0x13   :  { %p999_p8 = por %p998_p7, %p997_p6 }
  0x15   :  { %p1000_p9 = pnand %p999_p8, %p993_p5 }
  0x17   :  { %1003 = shalt.err (!%p1000_p9)
}
  0x18   :  { %s1034_s28 = smov 128   ;;  %s1035_s29 = smov 8  }
  0x19   :  { %36 = dma.hbm_to_vmem [thread:$0]  %s1617_s1, 4096, %s31_s26, [#allocation6], %s1034_s28, %s1034_s28, %s1035_s29  }
  0x1a   :  { %1024 = dma.done.wait [#allocation3], 4096  }
  0x1b   :  { %1025 = vsyncadd [#allocation3], 4294963200 }
  0x1c   :  { %1026 = dma.done.wait [#allocation6], 4096  }
  0x1d   :  { %1027 = vsyncadd [#allocation6], 4294963200  ;;  %v908_v0 = vld [vmem:[#allocation5 + $0x74] ss:$8 sps:$4 sm:$0xff]   ;;  %v910_v1 = vld [vmem:[#allocation5 + $0x70] ss:$8 sps:$4 sm:$0xff]  }
  0x1e   :  { %301 = vmatprep.subr.bf16.mxu0 %v908_v0  ;;  %v911_v2 = vld [vmem:[#allocation5 + $0x64] ss:$8 sps:$4 sm:$0xff]   ;;  %869 = vmatprep.subr.bf16.mxu1 %v908_v0  ;;  %v913_v3 = vld [vmem:[#allocation5 + $0x60] ss:$8 sps:$4 sm:$0xff]   ;;  %v914_v4 = vld [vmem:[#allocation5 + $0x54] ss:$8 sps:$4 sm:$0xff]  }
  0x1f   :  { %302 = vmatpush1.bf16.msra.mxu0 %v910_v1  ;;  %885 = vmatpush1.bf16.msra.mxu1 %v910_v1  ;;  %v916_v5 = vld [vmem:[#allocation5 + $0x50] ss:$8 sps:$4 sm:$0xff]   ;;  %v917_v6 = vld [vmem:[#allocation5 + $0x44] ss:$8 sps:$4 sm:$0xff]   ;;  %v919_v7 = vld [vmem:[#allocation5 + $0x40] ss:$8 sps:$4 sm:$0xff]  }
  0x20   :  { %303 = vmatprep.subr.bf16.mxu0 %v911_v2  ;;  %870 = vmatprep.subr.bf16.mxu1 %v911_v2  ;;  %v920_v8 = vld [vmem:[#allocation5 + $0x34] ss:$8 sps:$4 sm:$0xff]   ;;  %v922_v9 = vld [vmem:[#allocation5 + $0x30] ss:$8 sps:$4 sm:$0xff]   ;;  %v923_v10 = vld [vmem:[#allocation5 + $0x24] ss:$8 sps:$4 sm:$0xff]  }
  0x21   :  { %v925_v11 = vld [vmem:[#allocation5 + $0x20] ss:$8 sps:$4 sm:$0xff]   ;;  %v926_v12 = vld [vmem:[#allocation5 + $0x14] ss:$8 sps:$4 sm:$0xff]   ;;  %v928_v16 = vld [vmem:[#allocation5 + $0x10] ss:$8 sps:$4 sm:$0xff]  }
  0x22   :  { %v50_v13 = vld [vmem:[#allocation2 + $0x8] sm:$0xff]  ;;  %v52_v14 = vld [vmem:[#allocation2 + $0x18] sm:$0xff]  ;;  %v1076_v38 = vld [vmem:[#allocation2] sm:$0xff] }
  0x23   :  { %304 = vmatpush1.bf16.msra.mxu0 %v913_v3  ;;  %886 = vmatpush1.bf16.msra.mxu1 %v913_v3  ;;  %v82_v15 = vpack.c.bf16 %v52_v14, %v50_v13  ;;  %v929_v17 = vld [vmem:[#allocation5 + $0x4] ss:$8 sps:$4 sm:$0xff]   ;;  %v68_v19 = vld [vmem:[#allocation2 + $0x98] sm:$0xff]  ;;  %v931_v21 = vld [vmem:[#allocation5] ss:$8 sps:$4 sm:$0xff]  }
  0x24   :  { %305 = vmatprep.subr.bf16.mxu0 %v914_v4  ;;  %871 = vmatprep.subr.bf16.mxu1 %v914_v4  ;;  %v66_v18 = vld [vmem:[#allocation2 + $0x88] sm:$0xff]  ;;  %v932_v22 = vld [vmem:[#allocation5 + $0xf4] ss:$8 sps:$4 sm:$0xff]   ;;  %v934_v23 = vld [vmem:[#allocation5 + $0xf0] ss:$8 sps:$4 sm:$0xff]  }
  0x25   :  { %333 = vmatprep.mubr.bf16.mxu0 %v82_v15  ;;  %v90_v20 = vpack.c.bf16 %v68_v19, %v66_v18  ;;  %v935_v24 = vld [vmem:[#allocation5 + $0xe4] ss:$8 sps:$4 sm:$0xff]   ;;  %v937_v25 = vld [vmem:[#allocation5 + $0xe0] ss:$8 sps:$4 sm:$0xff]   ;;  %v938_v26 = vld [vmem:[#allocation5 + $0xd4] ss:$8 sps:$4 sm:$0xff]   ;;  %v131_v18 = vlaneseq }
  0x26   :  { %v940_v27 = vld [vmem:[#allocation5 + $0xd0] ss:$8 sps:$4 sm:$0xff]   ;;  %v941_v28 = vld [vmem:[#allocation5 + $0xc4] ss:$8 sps:$4 sm:$0xff]   ;;  %v943_v29 = vld [vmem:[#allocation5 + $0xc0] ss:$8 sps:$4 sm:$0xff]  }
  0x27   :  { %306 = vmatpush1.bf16.msra.mxu0 %v916_v5  ;;  %887 = vmatpush1.bf16.msra.mxu1 %v916_v5  ;;  %v944_v30 = vld [vmem:[#allocation5 + $0xb4] ss:$8 sps:$4 sm:$0xff]   ;;  %v946_v31 = vld [vmem:[#allocation5 + $0xb0] ss:$8 sps:$4 sm:$0xff]   ;;  %v947_v32 = vld [vmem:[#allocation5 + $0xa4] ss:$8 sps:$4 sm:$0xff]  }
  0x28   :  { %307 = vmatprep.subr.bf16.mxu0 %v917_v6  ;;  %872 = vmatprep.subr.bf16.mxu1 %v917_v6  ;;  %v949_v33 = vld [vmem:[#allocation5 + $0xa0] ss:$8 sps:$4 sm:$0xff]   ;;  %v950_v34 = vld [vmem:[#allocation5 + $0x94] ss:$8 sps:$4 sm:$0xff]   ;;  %v952_v35 = vld [vmem:[#allocation5 + $0x90] ss:$8 sps:$4 sm:$0xff]  }
  0x29   :  { %373 = vmatprep.mubr.bf16.mxu1 %v90_v20  ;;  %v953_v36 = vld [vmem:[#allocation5 + $0x84] ss:$8 sps:$4 sm:$0xff]   ;;  %v955_v37 = vld [vmem:[#allocation5 + $0x80] ss:$8 sps:$4 sm:$0xff]   ;;  %v1078_v39 = vld [vmem:[#allocation2 + $0x10] sm:$0xff] }
  0x2a   :  { %v1080_v40 = vld [vmem:[#allocation2 + $0x28] sm:$0xff]  ;;  %v1082_v41 = vld [vmem:[#allocation2 + $0x80] sm:$0xff]  ;;  %v1084_v42 = vld [vmem:[#allocation2 + $0x90] sm:$0xff]  ;;  %v81_v46 = vpack.c.bf16 %v1078_v39, %v1076_v38 }
  0x2b   :  { %308 = vmatpush1.bf16.msra.mxu0 %v919_v7  ;;  %888 = vmatpush1.bf16.msra.mxu1 %v919_v7  ;;  %1651 = vst [vmem:[#allocation11_spill] sm:$0xff] %v1080_v40  ;;  %v1086_v43 = vld [vmem:[#allocation2 + $0x38] sm:$0xff]  ;;  %v1088_v44 = vld [vmem:[#allocation2 + $0xa8] sm:$0xff]  ;;  %v89_v47 = vpack.c.bf16 %v1084_v42, %v1082_v41  ;;  %v1100_v50 = vld [vmem:[#allocation2 + $0x20] sm:$0xff] }
  0x2c   :  { %309 = vmatprep.subr.bf16.mxu0 %v920_v8  ;;  %873 = vmatprep.subr.bf16.mxu1 %v920_v8  ;;  %1652 = vst [vmem:[#allocation12_spill] sm:$0xff] %v1086_v43  ;;  %1653 = vst [vmem:[#allocation13_spill] sm:$0xff] %v1088_v44  ;;  %v1090_v45 = vld [vmem:[#allocation2 + $0xb8] sm:$0xff]  ;;  %v84_v48 = vpack.c.bf16 %v1086_v43, %v1080_v40  ;;  %v1102_v51 = vld [vmem:[#allocation2 + $0x30] sm:$0xff] }
  0x2d   :  { %1654 = vst [vmem:[#allocation14_spill] sm:$0xff] %v1090_v45  ;;  %v92_v49 = vpack.c.bf16 %v1090_v45, %v1088_v44  ;;  %v1104_v52 = vld [vmem:[#allocation2 + $0x48] sm:$0xff]  ;;  %v1106_v53 = vld [vmem:[#allocation2 + $0xa0] sm:$0xff]  ;;  %v1108_v54 = vld [vmem:[#allocation2 + $0xb0] sm:$0xff]  ;;  %v83_v58 = vpack.c.bf16 %v1102_v51, %v1100_v50 }
  0x2e   :  { %1655 = vst [vmem:[#allocation15_spill] sm:$0xff] %v1104_v52  ;;  %v1110_v55 = vld [vmem:[#allocation2 + $0x58] sm:$0xff]  ;;  %v1112_v56 = vld [vmem:[#allocation2 + $0xc8] sm:$0xff]  ;;  %v91_v59 = vpack.c.bf16 %v1108_v54, %v1106_v53  ;;  %v1124_v62 = vld [vmem:[#allocation2 + $0x40] sm:$0xff] }
  0x2f   :  { %310 = vmatpush1.bf16.msra.mxu0 %v922_v9  ;;  %889 = vmatpush1.bf16.msra.mxu1 %v922_v9  ;;  %1656 = vst [vmem:[#allocation16_spill] sm:$0xff] %v1110_v55  ;;  %1657 = vst [vmem:[#allocation17_spill] sm:$0xff] %v1112_v56  ;;  %v1114_v57 = vld [vmem:[#allocation2 + $0xd8] sm:$0xff]  ;;  %v86_v60 = vpack.c.bf16 %v1110_v55, %v1104_v52  ;;  %v1126_v63 = vld [vmem:[#allocation2 + $0x50] sm:$0xff] }
  0x30   :  { %311 = vmatprep.subr.bf16.mxu0 %v923_v10  ;;  %874 = vmatprep.subr.bf16.mxu1 %v923_v10  ;;  %1658 = vst [vmem:[#allocation18_spill] sm:$0xff] %v1114_v57  ;;  %v94_v61 = vpack.c.bf16 %v1114_v57, %v1112_v56  ;;  %v1128_v0 = vld [vmem:[#allocation2 + $0x68] sm:$0xff]  ;;  %v1130_v1 = vld [vmem:[#allocation2 + $0xc0] sm:$0xff]  ;;  %v1132_v2 = vld [vmem:[#allocation2 + $0xd0] sm:$0xff]  ;;  %v85_v6 = vpack.c.bf16 %v1126_v63, %v1124_v62 }
  0x31   :  { %1659 = vst [vmem:[#allocation19_spill] sm:$0xff] %v1128_v0  ;;  %1660 = vst [vmem:[#allocation20_spill] sm:$0xff] %v1130_v1  ;;  %v1134_v3 = vld [vmem:[#allocation2 + $0x78] sm:$0xff]  ;;  %v1136_v4 = vld [vmem:[#allocation2 + $0xe8] sm:$0xff]  ;;  %v93_v7 = vpack.c.bf16 %v1132_v2, %v1130_v1 }
  0x32   :  { %1661 = vst [vmem:[#allocation21_spill] sm:$0xff] %v1132_v2  ;;  %1662 = vst [vmem:[#allocation22_spill] sm:$0xff] %v1134_v3  ;;  %v1138_v5 = vld [vmem:[#allocation2 + $0xf8] sm:$0xff]  ;;  %v88_v8 = vpack.c.bf16 %v1134_v3, %v1128_v0  ;;  %v1148_v10 = vld [vmem:[#allocation2 + $0x60] sm:$0xff] }
  0x33   :  { %312 = vmatpush1.bf16.msra.mxu0 %v925_v11  ;;  %890 = vmatpush1.bf16.msra.mxu1 %v925_v11  ;;  %1663 = vst [vmem:[#allocation23_spill] sm:$0xff] %v1136_v4  ;;  %1664 = vst [vmem:[#allocation24_spill] sm:$0xff] %v1138_v5  ;;  %v96_v9 = vpack.c.bf16 %v1138_v5, %v1136_v4  ;;  %v1150_v11 = vld [vmem:[#allocation2 + $0x70] sm:$0xff] }
  0x34   :  { %313 = vmatprep.subr.bf16.mxu0 %v926_v12  ;;  %875 = vmatprep.subr.bf16.mxu1 %v926_v12  ;;  %v1152_v12 = vld [vmem:[#allocation2 + $0xe0] sm:$0xff]  ;;  %v1154_v13 = vld [vmem:[#allocation2 + $0xf0] sm:$0xff]  ;;  %v87_v14 = vpack.c.bf16 %v1150_v11, %v1148_v10 }
  0x35   :  { %1665 = vst [vmem:[#allocation25_spill] sm:$0xff] %v1152_v12  ;;  %1666 = vst [vmem:[#allocation26_spill] sm:$0xff] %v1154_v13  ;;  %v95_v15 = vpack.c.bf16 %v1154_v13, %v1152_v12 }
  0x37   :  { %314 = vmatpush1.bf16.msra.mxu0 %v928_v16  ;;  %891 = vmatpush1.bf16.msra.mxu1 %v928_v16 }
  0x38   :  { %315 = vmatprep.subr.bf16.mxu0 %v929_v17  ;;  %876 = vmatprep.subr.bf16.mxu1 %v929_v17 }
  0x3b   :  { %316 = vmatpush1.bf16.msra.mxu0 %v931_v21  ;;  %892 = vmatpush1.bf16.msra.mxu1 %v931_v21 }
  0x3c   :  { %317 = vmatprep.subr.bf16.mxu0 %v932_v22  ;;  %877 = vmatprep.subr.bf16.mxu1 %v932_v22 }
  0x3f   :  { %318 = vmatpush2.bf16.msra.mxu0 %v934_v23  ;;  %893 = vmatpush2.bf16.msra.mxu1 %v934_v23  ;;  %v132_v23 = vshrl.u32 %v131_v18, 7 }
  0x40   :  { %319 = vmatprep.subr.bf16.mxu0 %v935_v24  ;;  %878 = vmatprep.subr.bf16.mxu1 %v935_v24 }
  0x43   :  { %320 = vmatpush2.bf16.msra.mxu0 %v937_v25  ;;  %894 = vmatpush2.bf16.msra.mxu1 %v937_v25 }
  0x44   :  { %321 = vmatprep.subr.bf16.mxu0 %v938_v26  ;;  %879 = vmatprep.subr.bf16.mxu1 %v938_v26 }
  0x47   :  { %322 = vmatpush2.bf16.msra.mxu0 %v940_v27  ;;  %895 = vmatpush2.bf16.msra.mxu1 %v940_v27 }
  0x48   :  { %323 = vmatprep.subr.bf16.mxu0 %v941_v28  ;;  %880 = vmatprep.subr.bf16.mxu1 %v941_v28  ;;  %v1160_v28 = vsub.s32 0, %v132_v23 }
  0x4b   :  { %324 = vmatpush2.bf16.msra.mxu0 %v943_v29  ;;  %896 = vmatpush2.bf16.msra.mxu1 %v943_v29  ;;  %v129_v29 = vld [vmem:[%s1618_s2] sm:$0x3] }
  0x4c   :  { %325 = vmatprep.subr.bf16.mxu0 %v944_v30  ;;  %881 = vmatprep.subr.bf16.mxu1 %v944_v30 }
  0x4f   :  { %326 = vmatpush2.bf16.msra.mxu0 %v946_v31  ;;  %897 = vmatpush2.bf16.msra.mxu1 %v946_v31 }
  0x50   :  { %327 = vmatprep.subr.bf16.mxu0 %v947_v32  ;;  %882 = vmatprep.subr.bf16.mxu1 %v947_v32  ;;  %v1165_v32 = vsub.s32 1, %v132_v23 }
  0x52   :  { %1667 = vst [vmem:[#allocation27_spill] sm:$0xff] %v1165_v32 }
  0x53   :  { %328 = vmatpush2.bf16.msra.mxu0 %v949_v33  ;;  %898 = vmatpush2.bf16.msra.mxu1 %v949_v33 }
  0x54   :  { %329 = vmatprep.subr.bf16.mxu0 %v950_v34  ;;  %883 = vmatprep.subr.bf16.mxu1 %v950_v34 }
  0x57   :  { %330 = vmatpush2.bf16.msra.mxu0 %v952_v35  ;;  %899 = vmatpush2.bf16.msra.mxu1 %v952_v35  ;;  %v1168_v35 = vrot.slane %v129_v29, %v1160_v28 }
  0x58   :  { %331 = vmatprep.subr.bf16.mxu0 %v953_v36  ;;  %884 = vmatprep.subr.bf16.mxu1 %v953_v36 }
  0x5b   :  { %332 = vmatpush2.bf16.msra.mxu0 %v955_v37  ;;  %900 = vmatpush2.bf16.msra.mxu1 %v955_v37 }
  0x5e   :  { %334 = vmatmul.mubr.bf16.vlgmr.msra.gmra.mxu0 %v81_v46  ;;  %374 = vmatmul.mubr.bf16.vlgmr.msra.gmra.mxu1 %v89_v47  ;;  %v1171_v46 = vrot.slane %v129_v29, %v1165_v32 }
  0x5f   :  { %343 = vmatprep.mubr.bf16.mxu0 %v84_v48  ;;  %383 = vmatprep.mubr.bf16.mxu1 %v92_v49 }
  0x66   :  { %344 = vmatmul.mubr.bf16.gmra.mxu0 %v83_v58  ;;  %384 = vmatmul.mubr.bf16.gmra.mxu1 %v91_v59 }
  0x67   :  { %353 = vmatprep.mubr.bf16.mxu0 %v86_v60  ;;  %393 = vmatprep.mubr.bf16.mxu1 %v94_v61 }
  0x6e   :  { %354 = vmatmul.mubr.bf16.gmra.mxu0 %v85_v6  ;;  %394 = vmatmul.mubr.bf16.gmra.mxu1 %v93_v7 }
  0x6f   :  { %363 = vmatprep.mubr.bf16.mxu0 %v88_v8  ;;  %403 = vmatprep.mubr.bf16.mxu1 %v96_v9 }
  0x76   :  { %364 = vmatmul.mubr.bf16.gmra.mxu0 %v87_v14  ;;  %404 = vmatmul.mubr.bf16.gmra.mxu1 %v95_v15 }
 0x11e   :  { %v335_v16 = vpop.f32.mrf.mxu0  ;;  %v375_v17 = vpop.f32.mrf.mxu1 }
 0x11f   :  { %v1177_v58 = vadd.f32 %v335_v16, %v1168_v35 }
 0x120   :  { %v337_v19 = vpop.f32.mrf.mxu0  ;;  %v377_v20 = vpop.f32.mrf.mxu1 }
 0x121   :  { %v1186_v6 = vadd.f32 %v337_v19, %v1171_v46  ;;  %v1240_v3 = vadd.f32 %v377_v20, %v1171_v46 }
 0x122   :  { %v339_v21 = vpop.f32.mrf.mxu0  ;;  %v379_v22 = vpop.f32.mrf.mxu1 }
 0x123   :  { %v1174_v47 = vadd.f32 %v339_v21, %v1168_v35 }
 0x124   :  { %v341_v24 = vpop.f32.mrf.mxu0  ;;  %v381_v25 = vpop.f32.mrf.mxu1 }
 0x125   :  { %v1180_v59 = vadd.f32 %v341_v24, %v1171_v46  ;;  %v414_v7 = vadd.f32 %v1174_v47, %v1177_v58 }
 0x126   :  { %v345_v26 = vpop.f32.mrf.mxu0  ;;  %v385_v27 = vpop.f32.mrf.mxu1 }
 0x127   :  { %v1183_v60 = vadd.f32 %v345_v26, %v1168_v35  ;;  %v435_v16 = vadd.f32 %v1180_v59, %v1186_v6 }
 0x128   :  { %v347_v30 = vpop.f32.mrf.mxu0  ;;  %v387_v31 = vpop.f32.mrf.mxu1 }
 0x129   :  { %v1191_v8 = vadd.f32 %v347_v30, %v1171_v46  ;;  %v415_v18 = vadd.f32 %v414_v7, %v1183_v60  ;;  %v1256_v20 = vadd.f32 %v387_v31, %v1171_v46 }
 0x12a   :  { %v349_v33 = vpop.f32.mrf.mxu0  ;;  %v389_v34 = vpop.f32.mrf.mxu1 }
 0x12b   :  { %v1194_v9 = vadd.f32 %v349_v33, %v1168_v35  ;;  %v436_v24 = vadd.f32 %v435_v16, %v1191_v8 }
 0x12c   :  { %v351_v36 = vpop.f32.mrf.mxu0  ;;  %v391_v37 = vpop.f32.mrf.mxu1 }
 0x12d   :  { %v1200_v21 = vadd.f32 %v351_v36, %v1171_v46  ;;  %v416_v26 = vadd.f32 %v415_v18, %v1194_v9 }
 0x12e   :  { %v355_v48 = vpop.f32.mrf.mxu0  ;;  %v395_v49 = vpop.f32.mrf.mxu1 }
 0x12f   :  { %v1203_v19 = vadd.f32 %v355_v48, %v1168_v35  ;;  %v437_v7 = vadd.f32 %v436_v24, %v1200_v21 }
 0x130   :  { %v357_v61 = vpop.f32.mrf.mxu0  ;;  %v397_v15 = vpop.f32.mrf.mxu1 }
 0x131   :  { %v1208_v29 = vadd.f32 %v357_v61, %v1171_v46  ;;  %v417_v36 = vadd.f32 %v416_v26, %v1203_v19  ;;  %v1272_v31 = vadd.f32 %v397_v15, %v1171_v46 }
 0x132   :  { %v359_v14 = vpop.f32.mrf.mxu0  ;;  %v399_v5 = vpop.f32.mrf.mxu1 }
 0x133   :  { %v1211_v30 = vadd.f32 %v359_v14, %v1168_v35  ;;  %v438_v18 = vadd.f32 %v437_v7, %v1208_v29 }
 0x134   :  { %v361_v23 = vpop.f32.mrf.mxu0  ;;  %v401_v56 = vpop.f32.mrf.mxu1 }
 0x135   :  { %v1216_v48 = vadd.f32 %v361_v23, %v1171_v46  ;;  %v418_v61 = vadd.f32 %v417_v36, %v1211_v30 }
 0x136   :  { %v365_v33 = vpop.f32.mrf.mxu0  ;;  %v405_v44 = vpop.f32.mrf.mxu1 }
 0x137   :  { %v1219_v4 = vadd.f32 %v365_v33, %v1168_v35  ;;  %v439_v24 = vadd.f32 %v438_v18, %v1216_v48  ;;  %v1232_v33 = vadd.f32 %v375_v17, %v1168_v35  ;;  %v1243_v18 = vadd.f32 %v379_v22, %v1168_v35 }
 0x138   :  { %v367_v16 = vpop.f32.mrf.mxu0  ;;  %v1248_v17 = vadd.f32 %v381_v25, %v1171_v46  ;;  %v407_v0 = vpop.f32.mrf.mxu1  ;;  %v1259_v22 = vadd.f32 %v389_v34, %v1168_v35  ;;  %v1264_v25 = vadd.f32 %v391_v37, %v1171_v46  ;;  %v1275_v34 = vadd.f32 %v399_v5, %v1168_v35 }
 0x139   :  { %v1224_v14 = vadd.f32 %v367_v16, %v1171_v46  ;;  %v419_v26 = vadd.f32 %v418_v61, %v1219_v4  ;;  %v1290_v43 = vadd.f32 %v407_v0, %v1171_v46 }
 0x13a   :  { %v369_v57 = vpop.f32.mrf.mxu0  ;;  %v409_v55 = vpop.f32.mrf.mxu1 }
 0x13b   :  { %v1229_v23 = vadd.f32 %v369_v57, %v1168_v35  ;;  %v440_v7 = vadd.f32 %v439_v24, %v1224_v14  ;;  %v1251_v24 = vadd.f32 %v385_v27, %v1168_v35  ;;  %v1267_v27 = vadd.f32 %v395_v49, %v1168_v35 }
 0x13c   :  { %v371_v45 = vpop.f32.mrf.mxu0  ;;  %v1281_v49 = vadd.f32 %v401_v56, %v1171_v46  ;;  %v411_v52 = vpop.f32.mrf.mxu1 }
 0x13d   :  { %v420_v36 = vadd.f32 %v419_v26, %v1229_v23  ;;  %v1237_v16 = vadd.f32 %v371_v45, %v1171_v46 }
 0x13f   :  { %v421_v57 = vadd.f32 %v420_v36, %v1232_v33  ;;  %v441_v61 = vadd.f32 %v440_v7, %v1237_v16 }
 0x141   :  { %v422_v45 = vadd.f32 %v421_v57, %v1243_v18  ;;  %v442_v26 = vadd.f32 %v441_v61, %v1240_v3 }
 0x143   :  { %v443_v36 = vadd.f32 %v442_v26, %v1248_v17  ;;  %v423_v7 = vadd.f32 %v422_v45, %v1251_v24 }
 0x145   :  { %v424_v57 = vadd.f32 %v423_v7, %v1259_v22  ;;  %v444_v61 = vadd.f32 %v443_v36, %v1256_v20  ;;  %v1285_v36 = vadd.f32 %v405_v44, %v1168_v35 }
 0x147   :  { %v425_v26 = vadd.f32 %v424_v57, %v1267_v27  ;;  %v445_v45 = vadd.f32 %v444_v61, %v1264_v25  ;;  %v1293_v57 = vadd.f32 %v409_v55, %v1168_v35 }
 0x149   :  { %v426_v37 = vadd.f32 %v425_v26, %v1275_v34  ;;  %v446_v7 = vadd.f32 %v445_v45, %v1272_v31  ;;  %v1298_v26 = vadd.f32 %v411_v52, %v1171_v46 }
 0x14b   :  { %v447_v15 = vadd.f32 %v446_v7, %v1281_v49  ;;  %v427_v5 = vadd.f32 %v426_v37, %v1285_v36 }
 0x14d   :  { %v448_v61 = vadd.f32 %v447_v15, %v1290_v43  ;;  %v428_v56 = vadd.f32 %v427_v5, %v1293_v57 }
 0x14f   :  { %v429_v44 = vrot.slane %v428_v56, 4  ;;  %v449_v45 = vadd.f32 %v448_v61, %v1298_v26 }
 0x151   :  { %v430_v40 = vadd.f32 %v429_v44, %v428_v56  ;;  %v450_v7 = vrot.slane %v449_v45, 4 }
 0x153   :  { %v431_v13 = vrot.slane %v430_v40, 2  ;;  %v451_v37 = vadd.f32 %v450_v7, %v449_v45 }
 0x155   :  { %v432_v12 = vadd.f32 %v431_v13, %v430_v40  ;;  %v452_v0 = vrot.slane %v451_v37, 2 }
 0x157   :  { %v433_v2 = vrot.slane %v432_v12, 1  ;;  %v453_v55 = vadd.f32 %v452_v0, %v451_v37 }
 0x159   :  { %v434_v1 = vadd.f32 %v433_v2, %v432_v12  ;;  %v454_v46 = vrot.slane %v453_v55, 1 }
 0x15b   :  { %v1301_v35 = vmul.f32 0.0078125, %v434_v1  ;;  %v455_v2 = vadd.f32 %v454_v46, %v453_v55 }
 0x15d   :  { %v1305_v15 = vsub.f32 %v1177_v58, %v1301_v35  ;;  %v1309_v52 = vsub.f32 %v1174_v47, %v1301_v35  ;;  %v1313_v5 = vsub.f32 %v1183_v60, %v1301_v35  ;;  %v1321_v12 = vsub.f32 %v1194_v9, %v1301_v35 }
 0x15e   :  { %v1325_v13 = vsub.f32 %v1203_v19, %v1301_v35  ;;  %v1329_v60 = vmul.f32 0.0078125, %v455_v2  ;;  %v1333_v61 = vsub.f32 %v1211_v30, %v1301_v35  ;;  %v1347_v45 = vsub.f32 %v1219_v4, %v1301_v35 }
 0x15f   :  { %v491_v40 = vmul.f32 %v1305_v15, %v1305_v15  ;;  %v493_v1 = vmul.f32 %v1309_v52, %v1309_v52  ;;  %v495_v47 = vmul.f32 %v1313_v5, %v1313_v5  ;;  %v497_v56 = vmul.f32 %v1321_v12, %v1321_v12 }
 0x160   :  { %v1339_v9 = vsub.f32 %v1186_v6, %v1329_v60  ;;  %v1343_v19 = vsub.f32 %v1180_v59, %v1329_v60  ;;  %v499_v30 = vmul.f32 %v1325_v13, %v1325_v13  ;;  %v1353_v37 = vsub.f32 %v1229_v23, %v1301_v35 }
 0x161   :  { %v523_v58 = vadd.f32 %v493_v1, %v491_v40  ;;  %v501_v6 = vmul.f32 %v1333_v61, %v1333_v61  ;;  %v1359_v59 = vsub.f32 %v1191_v8, %v1329_v60  ;;  %v1367_v46 = vsub.f32 %v1232_v33, %v1301_v35 }
 0x162   :  { %v492_v4 = vmul.f32 %v1339_v9, %v1339_v9  ;;  %v494_v55 = vmul.f32 %v1343_v19, %v1343_v19  ;;  %v503_v23 = vmul.f32 %v1347_v45, %v1347_v45  ;;  %v1373_v1 = vsub.f32 %v1200_v21, %v1329_v60 }
 0x163   :  { %v524_v44 = vadd.f32 %v523_v58, %v495_v47  ;;  %v1377_v8 = vsub.f32 %v1243_v18, %v1301_v35  ;;  %v505_v2 = vmul.f32 %v1353_v37, %v1353_v37  ;;  %v1383_v33 = vsub.f32 %v1208_v29, %v1329_v60 }
 0x164   :  { %v496_v58 = vmul.f32 %v1359_v59, %v1359_v59  ;;  %v1389_v21 = vsub.f32 %v1251_v24, %v1301_v35  ;;  %v507_v18 = vmul.f32 %v1367_v46, %v1367_v46  ;;  %v498_v29 = vmul.f32 %v1373_v1, %v1373_v1 }
 0x165   :  { %v525_v7 = vadd.f32 %v524_v44, %v497_v56  ;;  %v544_v56 = vadd.f32 %v494_v55, %v492_v4  ;;  %v509_v24 = vmul.f32 %v1377_v8, %v1377_v8  ;;  %v1407_v4 = vsub.f32 %v1224_v14, %v1329_v60 }
 0x167   :  { %v526_v0 = vadd.f32 %v525_v7, %v499_v30  ;;  %v1395_v30 = vsub.f32 %v1216_v48, %v1329_v60  ;;  %v545_v7 = vadd.f32 %v544_v56, %v496_v58  ;;  %1668 = vst [vmem:[#allocation28_spill] sm:$0xff] %v1407_v4  ;;  %v500_v48 = vmul.f32 %v1383_v33, %v1383_v33 }
 0x168   :  { %v1425_v58 = vsub.f32 %v1275_v34, %v1301_v35 }
 0x169   :  { %v527_v40 = vadd.f32 %v526_v0, %v501_v6  ;;  %v1401_v6 = vsub.f32 %v1259_v22, %v1301_v35  ;;  %v546_v55 = vadd.f32 %v545_v7, %v498_v29  ;;  %v511_v22 = vmul.f32 %v1389_v21, %v1389_v21 }
 0x16a   :  { %v502_v14 = vmul.f32 %v1395_v30, %v1395_v30  ;;  %v1437_v29 = vsub.f32 %v1285_v36, %v1301_v35  ;;  %v517_v36 = vmul.f32 %v1425_v58, %v1425_v58 }
 0x16b   :  { %v528_v47 = vadd.f32 %v527_v40, %v503_v23  ;;  %v1413_v23 = vsub.f32 %v1267_v27, %v1301_v35  ;;  %v513_v27 = vmul.f32 %v1401_v6, %v1401_v6 }
 0x16d   :  { %v529_v44 = vadd.f32 %v528_v47, %v505_v2  ;;  %v1419_v2 = vsub.f32 %v1237_v16, %v1329_v60  ;;  %v547_v47 = vadd.f32 %v546_v55, %v500_v48  ;;  %v504_v16 = vmul.f32 %v1407_v4, %v1407_v4 }
 0x16e   :  { %v515_v34 = vmul.f32 %v1413_v23, %v1413_v23  ;;  %v1449_v48 = vsub.f32 %v1293_v57, %v1301_v35  ;;  %v1463_v57 = vsub.f32 %v1264_v25, %v1329_v60  ;;  %v1477_v25 = vsub.f32 %v1281_v49, %v1329_v60 }
 0x16f   :  { %v530_v0 = vadd.f32 %v529_v44, %v507_v18  ;;  %1669 = vst [vmem:[#allocation29_spill] sm:$0xff] %v1419_v2  ;;  %v1431_v18 = vsub.f32 %v1240_v3, %v1329_v60  ;;  %v548_v44 = vadd.f32 %v547_v47, %v502_v14  ;;  %v506_v3 = vmul.f32 %v1419_v2, %v1419_v2 }
 0x170   :  { %v519_v14 = vmul.f32 %v1437_v29, %v1437_v29  ;;  %1673 = vst [vmem:[#allocation33_spill] sm:$0xff] %v1463_v57  ;;  %1675 = vst [vmem:[#allocation35_spill] sm:$0xff] %v1477_v25  ;;  %v518_v49 = vmul.f32 %v1477_v25, %v1477_v25 }
 0x171   :  { %v531_v40 = vadd.f32 %v530_v0, %v509_v24  ;;  %1670 = vst [vmem:[#allocation30_spill] sm:$0xff] %v1431_v18  ;;  %v1443_v24 = vsub.f32 %v1248_v17, %v1329_v60  ;;  %v549_v0 = vadd.f32 %v548_v44, %v504_v16  ;;  %v508_v17 = vmul.f32 %v1431_v18, %v1431_v18 }
 0x172   :  { %v1471_v16 = vsub.f32 %v1272_v31, %v1329_v60 }
 0x173   :  { %v532_v56 = vadd.f32 %v531_v40, %v511_v22  ;;  %1671 = vst [vmem:[#allocation31_spill] sm:$0xff] %v1443_v24  ;;  %v1455_v22 = vsub.f32 %v1256_v20, %v1329_v60  ;;  %v550_v40 = vadd.f32 %v549_v0, %v506_v3  ;;  %v510_v35 = vmul.f32 %v1443_v24, %v1443_v24 }
 0x174   :  { %v521_v20 = vmul.f32 %v1449_v48, %v1449_v48  ;;  %1674 = vst [vmem:[#allocation34_spill] sm:$0xff] %v1471_v16  ;;  %v514_v3 = vmul.f32 %v1463_v57, %v1463_v57  ;;  %v516_v31 = vmul.f32 %v1471_v16, %v1471_v16 }
 0x175   :  { %v533_v7 = vadd.f32 %v532_v56, %v513_v27  ;;  %1672 = vst [vmem:[#allocation32_spill] sm:$0xff] %v1455_v22  ;;  %v551_v27 = vadd.f32 %v550_v40, %v508_v17  ;;  %v512_v44 = vmul.f32 %v1455_v22, %v1455_v22 }
 0x177   :  { %v534_v55 = vadd.f32 %v533_v7, %v515_v34  ;;  %v552_v34 = vadd.f32 %v551_v27, %v510_v35 }
 0x179   :  { %v535_v47 = vadd.f32 %v534_v55, %v517_v36  ;;  %v553_v0 = vadd.f32 %v552_v34, %v512_v44  ;;  %v1483_v55 = vsub.f32 %v1290_v43, %v1329_v60 }
 0x17b   :  { %v536_v56 = vadd.f32 %v535_v47, %v519_v14  ;;  %1676 = vst [vmem:[#allocation36_spill] sm:$0xff] %v1483_v55  ;;  %v554_v17 = vadd.f32 %v553_v0, %v514_v3  ;;  %v1489_v14 = vsub.f32 %v1298_v26, %v1329_v60  ;;  %v520_v27 = vmul.f32 %v1483_v55, %v1483_v55 }
 0x17d   :  { %v537_v7 = vadd.f32 %v536_v56, %v521_v20  ;;  %1677 = vst [vmem:[#allocation37_spill] sm:$0xff] %v1489_v14  ;;  %v555_v47 = vadd.f32 %v554_v17, %v516_v31  ;;  %v522_v56 = vmul.f32 %v1489_v14, %v1489_v14 }
 0x17f   :  { %v538_v36 = vrot.slane %v537_v7, 4  ;;  %v556_v20 = vadd.f32 %v555_v47, %v518_v49  ;;  %v1503_v49 = vld [vmem:[%s1620_s4] sm:$0x3] }
 0x180   :  { %1678 = vst [vmem:[#allocation38_spill] sm:$0xff] %v1503_v49 }
 0x181   :  { %v539_v40 = vadd.f32 %v538_v36, %v537_v7  ;;  %v557_v44 = vadd.f32 %v556_v20, %v520_v27 }
 0x183   :  { %v540_v35 = vrot.slane %v539_v40, 2  ;;  %v558_v7 = vadd.f32 %v557_v44, %v522_v56 }
 0x185   :  { %v541_v43 = vadd.f32 %v540_v35, %v539_v40  ;;  %v559_v0 = vrot.slane %v558_v7, 4  ;;  %v603_v40 = vld [vmem:[%s1619_s3] sm:$0x3]  ;;  %s1036_s3 = smov [#allocation7]  }
 0x186   :  { %v608_v35 = vrot.slane %v603_v40, %v1160_v28  ;;  %v1512_v20 = vrot.slane %v603_v40, %v1165_v32  ;;  %s824_s4 = sshll.u32 %s1036_s3, 4  ;;  %s825_s4 = int_to_ptr.vmem [resolvable:$true] %s824_s4 }
 0x187   :  { %v542_v34 = vrot.slane %v541_v43, 1  ;;  %v560_v60 = vadd.f32 %v559_v0, %v558_v7  ;;  %s1004_s10 = scalar_lea.vmem %s825_s4, 4096  ;;  %p1009_p11 = scmp.lt.s32.totalorder %s825_s4, %s825_s4 }
 0x188   :  { %1679 = vst [vmem:[#allocation39_spill] sm:$0xff] %v1512_v20  ;;  %p1005_p10 = scmp.ne.s32.totalorder %s825_s4, %s1004_s10  ;;  %p1010_p12 = scmp.lt.s32.totalorder %s1004_s10, %s1004_s10 }
 0x189   :  { %v543_v3 = vadd.f32 %v542_v34, %v541_v43  ;;  %v561_v16 = vrot.slane %v560_v60, 2 }
 0x18a   :  { %p1011_p13 = por %p1010_p12, %p1009_p11 }
 0x18b   :  { %v565_v26 = vmul.f32 0.0078125, %v543_v3  ;;  %v562_v31 = vadd.f32 %v561_v16, %v560_v60  ;;  %v652_v16 = vrot.slane %v1503_v49, %v1160_v28 }
 0x18c   :  { %p1012_p0 = pnand %p1011_p13, %p1005_p10 }
 0x18d   :  { %v567_v36 = vadd.f32 1e-05, %v565_v26  ;;  %v563_v17 = vrot.slane %v562_v31, 1 }
 0x18f   :  { %956 = vrsqrt.f32 %v567_v36  ;;  %v564_v25 = vadd.f32 %v563_v17, %v562_v31 }
 0x191   :  { %v566_v57 = vmul.f32 0.0078125, %v564_v25 }
 0x193   :  { %v568_v55 = vadd.f32 1e-05, %v566_v57 }
 0x195   :  { %958 = vrsqrt.f32 %v568_v55 }
 0x19c   :  { %v957_v47 = vpop.eup %956 }
 0x19d   :  { %v571_v27 = vmul.f32 %v957_v47, %v1305_v15  ;;  %v573_v57 = vmul.f32 %v957_v47, %v1309_v52  ;;  %v575_v25 = vmul.f32 %v957_v47, %v1313_v5  ;;  %v577_v43 = vmul.f32 %v957_v47, %v1321_v12 }
 0x19e   :  { %v579_v56 = vmul.f32 %v957_v47, %v1325_v13  ;;  %v581_v55 = vmul.f32 %v957_v47, %v1333_v61  ;;  %v583_v44 = vmul.f32 %v957_v47, %v1347_v45  ;;  %v585_v34 = vmul.f32 %v957_v47, %v1353_v37 }
 0x19f   :  { %v587_v28 = vmul.f32 %v957_v47, %v1367_v46  ;;  %v589_v15 = vmul.f32 %v957_v47, %v1377_v8  ;;  %v591_v52 = vmul.f32 %v957_v47, %v1389_v21  ;;  %v593_v5 = vmul.f32 %v957_v47, %v1401_v6 }
 0x1a0   :  { %v595_v7 = vmul.f32 %v957_v47, %v1413_v23  ;;  %v597_v12 = vmul.f32 %v957_v47, %v1425_v58  ;;  %v599_v13 = vmul.f32 %v957_v47, %v1437_v29  ;;  %v601_v61 = vmul.f32 %v957_v47, %v1449_v48 }
 0x1a1   :  { %v615_v3 = vmul.f32 %v608_v35, %v571_v27  ;;  %v617_v45 = vmul.f32 %v608_v35, %v573_v57  ;;  %v619_v0 = vmul.f32 %v608_v35, %v575_v25  ;;  %v621_v37 = vmul.f32 %v608_v35, %v577_v43 }
 0x1a2   :  { %v623_v26 = vmul.f32 %v608_v35, %v579_v56  ;;  %v625_v46 = vmul.f32 %v608_v35, %v581_v55  ;;  %v627_v60 = vmul.f32 %v608_v35, %v583_v44  ;;  %v629_v8 = vmul.f32 %v608_v35, %v585_v34  ;;  %v1527_v25 = vpop.eup %958 }
 0x1a3   :  { %v631_v36 = vmul.f32 %v608_v35, %v587_v28  ;;  %v633_v21 = vmul.f32 %v608_v35, %v589_v15  ;;  %v635_v31 = vmul.f32 %v608_v35, %v591_v52  ;;  %v637_v6 = vmul.f32 %v608_v35, %v593_v5 }
 0x1a4   :  { %v639_v17 = vmul.f32 %v608_v35, %v595_v7  ;;  %v641_v23 = vmul.f32 %v608_v35, %v597_v12  ;;  %v643_v40 = vmul.f32 %v608_v35, %v599_v13  ;;  %v645_v58 = vmul.f32 %v608_v35, %v601_v61 }
 0x1a5   :  { %v659_v14 = vadd.f32 %v652_v16, %v615_v3  ;;  %v661_v29 = vadd.f32 %v652_v16, %v617_v45  ;;  %v663_v20 = vadd.f32 %v652_v16, %v619_v0  ;;  %v665_v48 = vadd.f32 %v652_v16, %v621_v37 }
 0x1a6   :  { %v667_v47 = vadd.f32 %v652_v16, %v623_v26  ;;  %v669_v27 = vadd.f32 %v652_v16, %v625_v46  ;;  %v671_v57 = vadd.f32 %v652_v16, %v627_v60  ;;  %v673_v43 = vadd.f32 %v652_v16, %v629_v8 }
 0x1a7   :  { %v675_v56 = vadd.f32 %v652_v16, %v631_v36  ;;  %v677_v55 = vadd.f32 %v652_v16, %v633_v21  ;;  %v679_v44 = vadd.f32 %v652_v16, %v635_v31  ;;  %v681_v34 = vadd.f32 %v652_v16, %v637_v6 }
 0x1a8   :  { %v683_v28 = vadd.f32 %v652_v16, %v639_v17  ;;  %v685_v15 = vadd.f32 %v652_v16, %v641_v23  ;;  %v687_v52 = vadd.f32 %v652_v16, %v643_v40  ;;  %v689_v5 = vadd.f32 %v652_v16, %v645_v58 }
 0x1a9   :  { %v691_v7 = vmul.f32 0.01, %v659_v14  ;;  %v693_v35 = vmul.f32 0.01, %v661_v29  ;;  %v695_v12 = vmul.f32 0.01, %v663_v20  ;;  %v1531_v45 = vmul.f32 %v1527_v25, %v1339_v9 }
 0x1aa   :  { %v697_v13 = vmul.f32 0.01, %v665_v48  ;;  %v699_v61 = vmul.f32 0.01, %v667_v47  ;;  %v701_v3 = vmul.f32 0.01, %v669_v27 }
 0x1ab   :  { %1680 = vst [vmem:[#allocation40_spill] sm:$0xff] %v1531_v45  ;;  %v703_v0 = vmul.f32 0.01, %v671_v57  ;;  %v705_v37 = vmul.f32 0.01, %v673_v43  ;;  %v723_v46 = vmax.f32 %v659_v14, %v691_v7  ;;  %v725_v21 = vmax.f32 %v661_v29, %v693_v35 }
 0x1ac   :  { %v707_v26 = vmul.f32 0.01, %v675_v56  ;;  %v709_v60 = vmul.f32 0.01, %v677_v55  ;;  %v711_v8 = vmul.f32 0.01, %v679_v44  ;;  %v727_v17 = vmax.f32 %v663_v20, %v695_v12 }
 0x1ad   :  { %v713_v36 = vmul.f32 0.01, %v681_v34  ;;  %v715_v31 = vmul.f32 0.01, %v683_v28  ;;  %v717_v16 = vmul.f32 0.01, %v685_v15  ;;  %v729_v40 = vmax.f32 %v665_v48, %v697_v13 }
 0x1ae   :  { %v719_v6 = vmul.f32 0.01, %v687_v52  ;;  %v721_v23 = vmul.f32 0.01, %v689_v5  ;;  %v731_v58 = vmax.f32 %v667_v47, %v699_v61  ;;  %v733_v22 = vmax.f32 %v669_v27, %v701_v3  ;;  %v1693_v12 = vld [vmem:[#allocation34_spill] sm:$0xff]  ;;  %v1694_v61 = vld [vmem:[#allocation35_spill] sm:$0xff] }
 0x1af   :  { %v735_v24 = vmax.f32 %v671_v57, %v703_v0  ;;  %v737_v18 = vmax.f32 %v673_v43, %v705_v37  ;;  %v739_v9 = vmax.f32 %v675_v56, %v707_v26  ;;  %v741_v45 = vmax.f32 %v677_v55, %v709_v60  ;;  %v1697_v26 = vld [vmem:[#allocation39_spill] sm:$0xff] }
 0x1b0   :  { %v743_v2 = vmax.f32 %v679_v44, %v711_v8  ;;  %v745_v4 = vmax.f32 %v681_v34, %v713_v36  ;;  %v747_v49 = vmax.f32 %v683_v28, %v715_v31  ;;  %v749_v14 = vmax.f32 %v685_v15, %v717_v16  ;;  %v1682_v44 = vld [vmem:[#allocation21_spill] sm:$0xff]  ;;  %v1689_v34 = vld [vmem:[#allocation30_spill] sm:$0xff]  ;;  %v1690_v28 = vld [vmem:[#allocation31_spill] sm:$0xff] }
 0x1b1   :  { %v751_v7 = vmax.f32 %v687_v52, %v719_v6  ;;  %v753_v32 = vmax.f32 %v689_v5, %v721_v23  ;;  %v755_v29 = vadd.f32 %v723_v46, %v1076_v38  ;;  %v757_v35 = vadd.f32 %v725_v21, %v1078_v39  ;;  %v1691_v15 = vld [vmem:[#allocation32_spill] sm:$0xff]  ;;  %v1692_v52 = vld [vmem:[#allocation33_spill] sm:$0xff] }
 0x1b2   :  { %v759_v20 = vadd.f32 %v727_v17, %v1100_v50  ;;  %v761_v48 = vadd.f32 %v729_v40, %v1102_v51  ;;  %v763_v47 = vadd.f32 %v731_v58, %v1124_v62  ;;  %v765_v27 = vadd.f32 %v733_v22, %v1126_v63  ;;  %v1681_v50 = vld [vmem:[#allocation20_spill] sm:$0xff]  ;;  %v1683_v63 = vld [vmem:[#allocation25_spill] sm:$0xff] }
 0x1b3   :  { %v767_v57 = vadd.f32 %v735_v24, %v1148_v10  ;;  %v769_v43 = vadd.f32 %v737_v18, %v1150_v11  ;;  %v771_v56 = vadd.f32 %v739_v9, %v1082_v41  ;;  %v773_v55 = vadd.f32 %v741_v45, %v1084_v42  ;;  %787 = vst [vmem:[#allocation7] sm:$0xff] %v755_v29  ;;  %v1684_v11 = vld [vmem:[#allocation26_spill] sm:$0xff]  ;;  %v1688_v22 = vld [vmem:[#allocation29_spill] sm:$0xff]  ;;  %v1695_v45 = vld [vmem:[#allocation36_spill] sm:$0xff] }
 0x1b4   :  { %789 = vst [vmem:[#allocation7 + $0x10] sm:$0xff] %v757_v35  ;;  %v775_v38 = vadd.f32 %v743_v2, %v1106_v53  ;;  %v777_v39 = vadd.f32 %v745_v4, %v1108_v54  ;;  %v779_v51 = vadd.f32 %v747_v49, %v1681_v50  ;;  %v781_v62 = vadd.f32 %v749_v14, %v1682_v44  ;;  %v1685_v2 = vld [vmem:[#allocation27_spill] sm:$0xff]  ;;  %v1686_v18 = vld [vmem:[#allocation38_spill] sm:$0xff]  ;;  %v1696_v37 = vld [vmem:[#allocation40_spill] sm:$0xff] }
 0x1b5   :  { %791 = vst [vmem:[#allocation7 + $0x20] sm:$0xff] %v759_v20  ;;  %793 = vst [vmem:[#allocation7 + $0x30] sm:$0xff] %v761_v48  ;;  %v783_v10 = vadd.f32 %v751_v7, %v1683_v63  ;;  %v785_v41 = vadd.f32 %v753_v32, %v1684_v11  ;;  %v574_v42 = vmul.f32 %v1527_v25, %v1343_v19  ;;  %v1687_v19 = vld [vmem:[#allocation28_spill] sm:$0xff]  ;;  %v1698_v36 = vld [vmem:[#allocation37_spill] sm:$0xff] }
 0x1b6   :  { %795 = vst [vmem:[#allocation7 + $0x40] sm:$0xff] %v763_v47  ;;  %797 = vst [vmem:[#allocation7 + $0x50] sm:$0xff] %v765_v27  ;;  %v576_v53 = vmul.f32 %v1527_v25, %v1359_v59  ;;  %v578_v54 = vmul.f32 %v1527_v25, %v1373_v1  ;;  %v580_v32 = vmul.f32 %v1527_v25, %v1383_v33 }
 0x1b7   :  { %799 = vst [vmem:[#allocation7 + $0x60] sm:$0xff] %v767_v57  ;;  %801 = vst [vmem:[#allocation7 + $0x70] sm:$0xff] %v769_v43  ;;  %v582_v4 = vmul.f32 %v1527_v25, %v1395_v30  ;;  %v656_v24 = vrot.slane %v1686_v18, %v1685_v2  ;;  %v584_v59 = vmul.f32 %v1527_v25, %v1687_v19 }
 0x1b8   :  { %803 = vst [vmem:[#allocation7 + $0x80] sm:$0xff] %v771_v56  ;;  %805 = vst [vmem:[#allocation7 + $0x90] sm:$0xff] %v773_v55  ;;  %v586_v49 = vmul.f32 %v1527_v25, %v1688_v22  ;;  %v588_v1 = vmul.f32 %v1527_v25, %v1689_v34  ;;  %v590_v33 = vmul.f32 %v1527_v25, %v1690_v28 }
 0x1b9   :  { %807 = vst [vmem:[#allocation7 + $0xa0] sm:$0xff] %v775_v38  ;;  %809 = vst [vmem:[#allocation7 + $0xb0] sm:$0xff] %v777_v39  ;;  %v592_v30 = vmul.f32 %v1527_v25, %v1691_v15  ;;  %v594_v5 = vmul.f32 %v1527_v25, %v1692_v52  ;;  %v596_v13 = vmul.f32 %v1527_v25, %v1693_v12 }
 0x1ba   :  { %811 = vst [vmem:[#allocation7 + $0xc0] sm:$0xff] %v779_v51  ;;  %813 = vst [vmem:[#allocation7 + $0xd0] sm:$0xff] %v781_v62  ;;  %v598_v3 = vmul.f32 %v1527_v25, %v1694_v61  ;;  %v600_v0 = vmul.f32 %v1527_v25, %v1695_v45  ;;  %v616_v46 = vmul.f32 %v1697_v26, %v1696_v37 }
 0x1bb   :  { %815 = vst [vmem:[#allocation7 + $0xe0] sm:$0xff] %v783_v10  ;;  %817 = vst [vmem:[#allocation7 + $0xf0] sm:$0xff] %v785_v41  ;;  %v618_v60 = vmul.f32 %v1697_v26, %v574_v42  ;;  %v620_v8 = vmul.f32 %v1697_v26, %v576_v53  ;;  %v602_v21 = vmul.f32 %v1527_v25, %v1698_v36 }
 0x1bc   :  { %v622_v31 = vmul.f32 %v1697_v26, %v578_v54  ;;  %v624_v16 = vmul.f32 %v1697_v26, %v580_v32  ;;  %v626_v6 = vmul.f32 %v1697_v26, %v582_v4  ;;  %v628_v17 = vmul.f32 %v1697_v26, %v584_v59 }
 0x1bd   :  { %v630_v23 = vmul.f32 %v1697_v26, %v586_v49  ;;  %v632_v40 = vmul.f32 %v1697_v26, %v588_v1  ;;  %v634_v58 = vmul.f32 %v1697_v26, %v590_v33  ;;  %v636_v9 = vmul.f32 %v1697_v26, %v592_v30 }
 0x1be   :  { %v638_v14 = vmul.f32 %v1697_v26, %v594_v5  ;;  %v640_v25 = vmul.f32 %v1697_v26, %v596_v13  ;;  %v642_v7 = vmul.f32 %v1697_v26, %v598_v3  ;;  %v644_v29 = vmul.f32 %v1697_v26, %v600_v0 }
 0x1bf   :  { %v660_v35 = vadd.f32 %v656_v24, %v616_v46  ;;  %v662_v20 = vadd.f32 %v656_v24, %v618_v60  ;;  %v664_v48 = vadd.f32 %v656_v24, %v620_v8  ;;  %v646_v47 = vmul.f32 %v1697_v26, %v602_v21  ;;  %v960_v8 = vld [vmem:[#allocation2 + $0x8] sm:$0xff]  ;;  %v961_v21 = vld [vmem:[#allocation2 + $0x18] sm:$0xff] }
 0x1c0   :  { %v666_v27 = vadd.f32 %v656_v24, %v622_v31  ;;  %v668_v57 = vadd.f32 %v656_v24, %v624_v16  ;;  %v670_v43 = vadd.f32 %v656_v24, %v626_v6  ;;  %v672_v56 = vadd.f32 %v656_v24, %v628_v17  ;;  %v1699_v16 = vld [vmem:[#allocation11_spill] sm:$0xff]  ;;  %v1700_v17 = vld [vmem:[#allocation12_spill] sm:$0xff] }
 0x1c1   :  { %v674_v55 = vadd.f32 %v656_v24, %v630_v23  ;;  %v676_v38 = vadd.f32 %v656_v24, %v632_v40  ;;  %v678_v39 = vadd.f32 %v656_v24, %v634_v58  ;;  %v680_v50 = vadd.f32 %v656_v24, %v636_v9  ;;  %v1701_v40 = vld [vmem:[#allocation15_spill] sm:$0xff]  ;;  %v1702_v9 = vld [vmem:[#allocation16_spill] sm:$0xff] }
 0x1c2   :  { %v682_v51 = vadd.f32 %v656_v24, %v638_v14  ;;  %v684_v44 = vadd.f32 %v656_v24, %v640_v25  ;;  %v686_v62 = vadd.f32 %v656_v24, %v642_v7  ;;  %v688_v63 = vadd.f32 %v656_v24, %v644_v29  ;;  %v1703_v25 = vld [vmem:[#allocation19_spill] sm:$0xff]  ;;  %v1704_v29 = vld [vmem:[#allocation22_spill] sm:$0xff] }
 0x1c3   :  { %v692_v10 = vmul.f32 0.01, %v660_v35  ;;  %v694_v11 = vmul.f32 0.01, %v662_v20  ;;  %v696_v41 = vmul.f32 0.01, %v664_v48  ;;  %v690_v42 = vadd.f32 %v656_v24, %v646_v47 }
 0x1c4   :  { %v698_v53 = vmul.f32 0.01, %v666_v27  ;;  %v700_v54 = vmul.f32 0.01, %v668_v57  ;;  %v702_v32 = vmul.f32 0.01, %v670_v43 }
 0x1c5   :  { %v704_v4 = vmul.f32 0.01, %v672_v56  ;;  %v706_v2 = vmul.f32 0.01, %v674_v55  ;;  %v708_v18 = vmul.f32 0.01, %v676_v38  ;;  %v724_v19 = vmax.f32 %v660_v35, %v692_v10 }
 0x1c6   :  { %v710_v59 = vmul.f32 0.01, %v678_v39  ;;  %v712_v22 = vmul.f32 0.01, %v680_v50  ;;  %v714_v49 = vmul.f32 0.01, %v682_v51  ;;  %v726_v34 = vmax.f32 %v662_v20, %v694_v11 }
 0x1c7   :  { %v716_v1 = vmul.f32 0.01, %v684_v44  ;;  %v718_v28 = vmul.f32 0.01, %v686_v62  ;;  %v720_v33 = vmul.f32 0.01, %v688_v63  ;;  %v728_v15 = vmax.f32 %v664_v48, %v696_v41 }
 0x1c8   :  { %v722_v30 = vmul.f32 0.01, %v690_v42  ;;  %v730_v52 = vmax.f32 %v666_v27, %v698_v53  ;;  %v732_v5 = vmax.f32 %v668_v57, %v700_v54  ;;  %v734_v12 = vmax.f32 %v670_v43, %v702_v32  ;;  %v962_v20 = vld [vmem:[#allocation2 + $0x88] sm:$0xff]  ;;  %v963_v47 = vld [vmem:[#allocation2 + $0x98] sm:$0xff]  ;;  %v1705_v57 = vld [vmem:[#allocation13_spill] sm:$0xff] }
 0x1c9   :  { %v736_v24 = vmax.f32 %v672_v56, %v704_v4  ;;  %v738_v13 = vmax.f32 %v674_v55, %v706_v2  ;;  %v740_v61 = vmax.f32 %v676_v38, %v708_v18  ;;  %v742_v3 = vmax.f32 %v678_v39, %v710_v59  ;;  %v1706_v56 = vld [vmem:[#allocation14_spill] sm:$0xff]  ;;  %v1707_v38 = vld [vmem:[#allocation17_spill] sm:$0xff] }
 0x1ca   :  { %v744_v45 = vmax.f32 %v680_v50, %v712_v22  ;;  %v746_v0 = vmax.f32 %v682_v51, %v714_v49  ;;  %v748_v37 = vmax.f32 %v684_v44, %v716_v1  ;;  %v750_v26 = vmax.f32 %v686_v62, %v718_v28  ;;  %v1708_v50 = vld [vmem:[#allocation18_spill] sm:$0xff]  ;;  %v1709_v44 = vld [vmem:[#allocation23_spill] sm:$0xff] }
 0x1cb   :  { %v752_v46 = vmax.f32 %v688_v63, %v720_v33  ;;  %v754_v60 = vmax.f32 %v690_v42, %v722_v30  ;;  %v756_v36 = vadd.f32 %v960_v8, %v724_v19  ;;  %v758_v31 = vadd.f32 %v961_v21, %v726_v34  ;;  %v1710_v63 = vld [vmem:[#allocation24_spill] sm:$0xff] }
 0x1cc   :  { %v760_v6 = vadd.f32 %v728_v15, %v1699_v16  ;;  %v762_v23 = vadd.f32 %v730_v52, %v1700_v17  ;;  %v764_v58 = vadd.f32 %v732_v5, %v1701_v40  ;;  %v766_v14 = vadd.f32 %v734_v12, %v1702_v9 }
 0x1cd   :  { %v768_v7 = vadd.f32 %v736_v24, %v1703_v25  ;;  %v770_v35 = vadd.f32 %v738_v13, %v1704_v29  ;;  %v772_v48 = vadd.f32 %v962_v20, %v740_v61  ;;  %v774_v27 = vadd.f32 %v963_v47, %v742_v3  ;;  %788 = vst [vmem:[#allocation7 + $0x8] sm:$0xff] %v756_v36 }
 0x1ce   :  { %790 = vst [vmem:[#allocation7 + $0x18] sm:$0xff] %v758_v31  ;;  %v776_v43 = vadd.f32 %v744_v45, %v1705_v57  ;;  %v778_v55 = vadd.f32 %v746_v0, %v1706_v56  ;;  %v780_v39 = vadd.f32 %v748_v37, %v1707_v38  ;;  %v782_v51 = vadd.f32 %v750_v26, %v1708_v50 }
 0x1cf   :  { %792 = vst [vmem:[#allocation7 + $0x28] sm:$0xff] %v760_v6  ;;  %794 = vst [vmem:[#allocation7 + $0x38] sm:$0xff] %v762_v23  ;;  %v784_v62 = vadd.f32 %v752_v46, %v1709_v44  ;;  %v786_v10 = vadd.f32 %v754_v60, %v1710_v63 }
 0x1d0   :  { %796 = vst [vmem:[#allocation7 + $0x48] sm:$0xff] %v764_v58  ;;  %798 = vst [vmem:[#allocation7 + $0x58] sm:$0xff] %v766_v14 }
 0x1d1   :  { %800 = vst [vmem:[#allocation7 + $0x68] sm:$0xff] %v768_v7  ;;  %802 = vst [vmem:[#allocation7 + $0x78] sm:$0xff] %v770_v35 }
 0x1d2   :  { %804 = vst [vmem:[#allocation7 + $0x88] sm:$0xff] %v772_v48  ;;  %806 = vst [vmem:[#allocation7 + $0x98] sm:$0xff] %v774_v27 }
 0x1d3   :  { %808 = vst [vmem:[#allocation7 + $0xa8] sm:$0xff] %v776_v43  ;;  %810 = vst [vmem:[#allocation7 + $0xb8] sm:$0xff] %v778_v55 }
 0x1d4   :  { %812 = vst [vmem:[#allocation7 + $0xc8] sm:$0xff] %v780_v39  ;;  %814 = vst [vmem:[#allocation7 + $0xd8] sm:$0xff] %v782_v51 }
 0x1d5   :  { %816 = vst [vmem:[#allocation7 + $0xe8] sm:$0xff] %v784_v62  ;;  %818 = vst [vmem:[#allocation7 + $0xf8] sm:$0xff] %v786_v10 }
 0x1d6   :  { %1015 = shalt.err (!%p1012_p0)
}
 0x1d7   :  { %830 = dma.vmem_to_hbm [thread:$0]  %s825_s4, 4096, %s1621_s5, [#allocation4], %s1031_s21, %s1031_s21, %s1032_s22  }
 0x1d8   :  { %1028 = dma.done.wait [#allocation4], 4096  }
 0x1d9   :  { %1029 = vsyncadd [#allocation4], 4294963200 }
 0x1da   :  { %834 = vsyncpa [#allocation3], 1 }
 0x1db   :  { %835 = vsyncpa [#allocation6], 1 }
 0x1dc   :  { %836 = vsyncpa [#allocation4], 1 }

</bundles_post_ra>
